<compile_context>
chip_gen: v7x
topology: tpu7x:2x2x1
jax: 0.10.0
libtpu: 0.0.40
codegen_flags: <defaults>
</compile_context>

<pallas_src>
import functools

import jax
import jax.numpy as jnp
from jax.experimental import pallas as pl
from jax.experimental.pallas import tpu as pltpu

IMG_SIZE = 28
D_IN = IMG_SIZE * IMG_SIZE * 3              # 2352 (not padded; full-dim block)
HIDDEN = 256
D_OUT = 1


def _round_up(x, m):
    return (x + m - 1) // m * m


def _pick_tile(b, tb_max):
    """Batch-tile: multiple of 8 (f32 sublane) capped at tb_max; split in two
    when a single tile would cover the whole batch (keeps both v7x TCs busy)."""
    tile = min(tb_max, _round_up(b, 8))
    if b > 16 and _round_up(b, tile) // tile < 2:
        tile = _round_up((b + 1) // 2, 8)
    return tile


def _disc_kernel(x_ref, w1_ref, b1_ref, w2_ref, b2_ref, o_ref):
    # In-kernel f32 -> bf16 cast (VPU, hidden under the x DMA), then layer 1 on
    # the MXU with f32 accumulation. K = 2352 -> one masked K-tile on the MXU.
    x = x_ref[...].astype(jnp.bfloat16)
    h = jnp.dot(x, w1_ref[...], preferred_element_type=jnp.float32)
    h = jnp.maximum(h + b1_ref[...], 0.0)                       # (TB, 256) f32
    # Layer 2 has a single output column: VPU multiply + XLU lane-reduce (free
    # slots under the DMA) instead of a (256, 1) MXU matmul. b2 scalar in SMEM.
    logits = jnp.sum(h * w2_ref[...], axis=-1, keepdims=True) + b2_ref[0, 0]
    o_ref[...] = jax.nn.sigmoid(logits).astype(o_ref.dtype)     # (TB, 1)


@functools.partial(jax.jit, static_argnames=("tb",))
def discriminator_forward(x_nchw, w1p, b1, w2row, b2, *, tb=1024):
    """x_nchw: (B, 3, 28, 28) float32. Params from prepare_params().
    Returns (B, 1) float32 probabilities."""
    b = x_nchw.shape[0]
    # == torch x.view(B, -1); stays f32 and UNPADDED in HBM (no extra pass).
    x_flat = x_nchw.reshape(b, -1).astype(jnp.float32)

    tile = _pick_tile(b, tb)
    b_pad = _round_up(b, tile)
    if b_pad != b:
        # Only ragged batches pay this copy; tile-multiple batches are zero-copy.
        x_flat = jnp.pad(x_flat, ((0, b_pad - b), (0, 0)))

    cost = pl.CostEstimate(
        flops=2 * b_pad * D_IN * HIDDEN + 4 * b_pad * HIDDEN,
        transcendentals=b_pad,
        bytes_accessed=b_pad * D_IN * 4 + D_IN * HIDDEN * 2
        + 2 * HIDDEN * 4 + 4 + b_pad * D_OUT * 4,
    )

    out = pl.pallas_call(
        _disc_kernel,
        out_shape=jax.ShapeDtypeStruct((b_pad, D_OUT), jnp.float32),
        grid=(b_pad // tile,),
        in_specs=[
            pl.BlockSpec((tile, D_IN), lambda i: (i, 0)),       # x tile, f32, pipelined
            pl.BlockSpec((D_IN, HIDDEN), lambda i: (0, 0)),     # W1 bf16 (grid-invariant)
            pl.BlockSpec((1, HIDDEN), lambda i: (0, 0)),        # b1 (f32)
            pl.BlockSpec((1, HIDDEN), lambda i: (0, 0)),        # W2 row (f32)
            pl.BlockSpec(memory_space=pltpu.MemorySpace.SMEM),  # b2 scalar (1,1)
        ],
        out_specs=pl.BlockSpec((tile, D_OUT), lambda i: (i, 0)),
        compiler_params=pltpu.CompilerParams(
            dimension_semantics=("parallel",),                  # megacore on v7x
            vmem_limit_bytes=48 * 1024 * 1024,                  # covers v5e 16 MiB default; < v7x 64 MiB physical
        ),
        cost_estimate=cost,
    )(x_flat, w1p, b1, w2row, b2)
    return out[:b]


def init_params(key):
    """Deterministic init mirroring torch.nn.Linear defaults:
    U(-1/sqrt(fan_in), 1/sqrt(fan_in)) for weight and bias. Math dtype f32."""
    k1, k2, k3, k4 = jax.random.split(key, 4)
    lim1 = 1.0 / jnp.sqrt(jnp.float32(D_IN))
    lim2 = 1.0 / jnp.sqrt(jnp.float32(HIDDEN))
    w1 = jax.random.uniform(k1, (D_IN, HIDDEN), jnp.float32, -lim1, lim1)
    b1 = jax.random.uniform(k2, (1, HIDDEN), jnp.float32, -lim1, lim1)
    w2 = jax.random.uniform(k3, (HIDDEN, D_OUT), jnp.float32, -lim2, lim2)
    b2 = jax.random.uniform(k4, (1, D_OUT), jnp.float32, -lim2, lim2)
    return w1, b1, w2, b2


def prepare_params(w1, b1, w2, b2):
    """One-time conversion for the kernel: cast the MXU weight to bf16 (kept
    unpadded; K=2352 is handled by one masked MXU K-tile). Biases and the
    layer-2 weights stay f32 (v5e-safe VPU math)."""
    w1p = w1.astype(jnp.bfloat16)                               # (2352, 256)
    w2row = w2.reshape(1, HIDDEN).astype(jnp.float32)           # (256,1) -> (1,256)
    return w1p, b1.astype(jnp.float32), w2row, b2.astype(jnp.float32)


if __name__ == "__main__":
    key = jax.random.PRNGKey(0)
    kx, kp = jax.random.split(key)

    w1, b1, w2, b2 = init_params(kp)
    w1p, b1p, w2row, b2p = prepare_params(w1, b1, w2, b2)

    def reference(x):
        # Pure-JAX reference of the same math (bf16 layer-1 operands, f32 accum).
        xf = x.reshape(x.shape[0], -1)
        h = jnp.maximum(
            xf.astype(jnp.bfloat16).astype(jnp.float32)
            @ w1.astype(jnp.bfloat16).astype(jnp.float32) + b1, 0.0)
        return jax.nn.sigmoid(h @ w2 + b2)

    # B=4: single full-dim block; B=20: two grid steps + ragged-batch pad path.
    for bsz in (4, 20):
        x = jax.random.normal(jax.random.fold_in(kx, bsz),
                              (bsz, 3, IMG_SIZE, IMG_SIZE), jnp.float32)
        out = jax.block_until_ready(discriminator_forward(x, w1p, b1p, w2row, b2p))
        ref = reference(x)
        assert out.shape == (bsz, 1)
        assert jnp.allclose(out, ref, atol=1e-2, rtol=1e-2)

    print("KERNEL_OK")
</pallas_src>

<mosaic_0001>
module attributes {stable_mosaic.version = 11 : i64} {
  func.func @_disc_kernel(%arg0: i32, %arg1: memref<8x2352xf32, #tpu.memory_space<vmem>>, %arg2: memref<2352x256xbf16, #tpu.memory_space<vmem>>, %arg3: memref<1x256xf32, #tpu.memory_space<vmem>>, %arg4: memref<1x256xf32, #tpu.memory_space<vmem>>, %arg5: memref<1x1xf32, #tpu.memory_space<smem>>, %arg6: memref<8x1xf32, #tpu.memory_space<vmem>>) attributes {dimension_semantics = [#tpu.dimension_semantics<parallel>], iteration_bounds = array<i64: 1>, scalar_prefetch = 0 : i64, scratch_operands = 0 : i64, tpu.core_type = #tpu.core_type<tc>, window_params = [{transform_indices = @transform_0, window_bounds = array<i64: 8, 2352>}, {pipeline_mode = #tpu.pipeline_mode<synchronous>, transform_indices = @transform_1, window_bounds = array<i64: 2352, 256>}, {pipeline_mode = #tpu.pipeline_mode<synchronous>, transform_indices = @transform_2, window_bounds = array<i64: 1, 256>}, {pipeline_mode = #tpu.pipeline_mode<synchronous>, transform_indices = @transform_3, window_bounds = array<i64: 1, 256>}, {transform_indices = @transform_4, window_bounds = array<i64: 1, 1>}, {transform_indices = @transform_5, window_bounds = array<i64: 8, 1>}]} {
    %c0 = arith.constant 0 : index
    %c0_0 = arith.constant 0 : index
    %0 = vector.load %arg1[%c0, %c0_0] : memref<8x2352xf32, #tpu.memory_space<vmem>>, vector<8x2352xf32>
    %1 = arith.truncf %0 : vector<8x2352xf32> to vector<8x2352xbf16>
    %c0_1 = arith.constant 0 : index
    %c0_2 = arith.constant 0 : index
    %2 = vector.load %arg2[%c0_1, %c0_2] : memref<2352x256xbf16, #tpu.memory_space<vmem>>, vector<2352x256xbf16>
    %cst = arith.constant dense<0.000000e+00> : vector<8x256xf32>
    %3 = tpu.matmul %1, %2, %cst {dimension_numbers = #tpu.dot_dimension_numbers<[1], [0], [0], [1], [0, 0, 1, 1], [], []>} : vector<8x2352xbf16>, vector<2352x256xbf16>, vector<8x256xf32> -> vector<8x256xf32>
    %c0_3 = arith.constant 0 : index
    %c0_4 = arith.constant 0 : index
    %4 = vector.load %arg3[%c0_3, %c0_4] : memref<1x256xf32, #tpu.memory_space<vmem>>, vector<1x256xf32>
    %5 = vector.broadcast %4 : vector<1x256xf32> to vector<8x256xf32>
    %6 = arith.addf %3, %5 : vector<8x256xf32>
    %cst_5 = arith.constant 0.000000e+00 : f32
    %7 = vector.broadcast %cst_5 : f32 to vector<8x256xf32>
    %8 = arith.maximumf %6, %7 : vector<8x256xf32>
    %c0_6 = arith.constant 0 : index
    %c0_7 = arith.constant 0 : index
    %9 = vector.load %arg4[%c0_6, %c0_7] : memref<1x256xf32, #tpu.memory_space<vmem>>, vector<1x256xf32>
    %10 = vector.broadcast %9 : vector<1x256xf32> to vector<8x256xf32>
    %11 = arith.mulf %8, %10 : vector<8x256xf32>
    %cst_8 = arith.constant dense<0.000000e+00> : vector<8xf32>
    %12 = vector.multi_reduction <add>, %11, %cst_8 [1] : vector<8x256xf32> to vector<8xf32>
    %13 = vector.shape_cast %12 : vector<8xf32> to vector<8x1xf32>
    %c0_9 = arith.constant 0 : index
    %c0_10 = arith.constant 0 : index
    %14 = memref.load %arg5[%c0_9, %c0_10] : memref<1x1xf32, #tpu.memory_space<smem>>
    %15 = vector.broadcast %14 : f32 to vector<8x1xf32>
    %16 = arith.addf %13, %15 : vector<8x1xf32>
    %17 = arith.negf %16 : vector<8x1xf32>
    %18 = math.exp %17 : vector<8x1xf32>
    %cst_11 = arith.constant 1.000000e+00 : f32
    %19 = vector.broadcast %cst_11 : f32 to vector<8x1xf32>
    %20 = arith.addf %19, %18 : vector<8x1xf32>
    %21 = arith.divf %19, %20 : vector<8x1xf32>
    %c0_12 = arith.constant 0 : index
    %c0_13 = arith.constant 0 : index
    %22 = vector.load %arg6[%c0_12, %c0_13] : memref<8x1xf32, #tpu.memory_space<vmem>>, vector<8x1xf32>
    tpu.vector_store %arg6[%c0_12, %c0_13], %21 {strides = array<i32>} : memref<8x1xf32, #tpu.memory_space<vmem>>, vector<8x1xf32>,
    return
  }
  func.func @transform_0(%arg0: i32) -> (i32, i32) {
    %c0_i32 = arith.constant 0 : i32
    %c0_i32_0 = arith.constant 0 : i32
    return %arg0, %c0_i32 : i32, i32
  }
  func.func @transform_1(%arg0: i32) -> (i32, i32) {
    %c0_i32 = arith.constant 0 : i32
    %c0_i32_0 = arith.constant 0 : i32
    %c0_i32_1 = arith.constant 0 : i32
    return %c0_i32, %c0_i32_0 : i32, i32
  }
  func.func @transform_2(%arg0: i32) -> (i32, i32) {
    %c0_i32 = arith.constant 0 : i32
    %c0_i32_0 = arith.constant 0 : i32
    %c0_i32_1 = arith.constant 0 : i32
    return %c0_i32, %c0_i32_0 : i32, i32
  }
  func.func @transform_3(%arg0: i32) -> (i32, i32) {
    %c0_i32 = arith.constant 0 : i32
    %c0_i32_0 = arith.constant 0 : i32
    %c0_i32_1 = arith.constant 0 : i32
    return %c0_i32, %c0_i32_0 : i32, i32
  }
  func.func @transform_4(%arg0: i32) -> (i32, i32) {
    %c0_i32 = arith.constant 0 : i32
    %c0_i32_0 = arith.constant 0 : i32
    %c0_i32_1 = arith.constant 0 : i32
    return %c0_i32, %c0_i32_0 : i32, i32
  }
  func.func @transform_5(%arg0: i32) -> (i32, i32) {
    %c0_i32 = arith.constant 0 : i32
    %c0_i32_0 = arith.constant 0 : i32
    return %arg0, %c0_i32 : i32, i32
  }
}

</mosaic_0001>

<bundles_post_ra>
// kernel: discriminator_forward.1
= control target key start
LH: loop header
LB: loop body
LE: loop exit
PB: predicated region body
PF: predicated region fallthrough
CT: control target
= control target key end

     0   :  { %11 = vsyncpa [#allocation4], 0  ;;  %s3318_s0 = inlined_call_operand.vmem [shape: f32[8,2352], index: 0, kind: input, shape index: {}]   ;;  %s3319_s1 = inlined_call_operand.hbm [shape: bf16[2352,256], index: 1, kind: input, shape index: {}]   ;;  %s3320_s2 = inlined_call_operand.hbm [shape: f32[1,256], index: 2, kind: input, shape index: {}]   ;;  %s3321_s3 = inlined_call_operand.hbm [shape: f32[1,256], index: 3, kind: input, shape index: {}]   ;;  %s3322_s4 = inlined_call_operand.<no memory space> [shape: f32[1,1], index: 4, kind: input, shape index: {}]   ;;  %s3323_s5 = inlined_call_operand.vmem [shape: f32[8,1], index: 5, kind: output, shape index: {}]  }
   0x1   :  { %12 = vsyncpa [#allocation6], 0  ;;  %s3176_s18 = smov [#allocation5]   ;;  %s3177_s20 = smov [#allocation3]  }
   0x2   :  { %s33_s19 = sshll.u32 %s3176_s18, 4  ;;  %s20_s21 = sshll.u32 %s3177_s20, 4  ;;  %s34_s19 = int_to_ptr.vmem [resolvable:$true] %s33_s19  ;;  %s3212_s21 = int_to_ptr.vmem [resolvable:$true] %s20_s21 }
   0x3   :  { %s3106_s24 = scalar_lea.hbm %s3320_s2, 32 }
   0x4   :  { %p3107_p0 = scmp.ne.s32.totalorder %s3320_s2, %s3106_s24  ;;  %p3110_p1 = scmp.lt.u32.totalorder %s3106_s24, %s3320_s2 }
   0x6   :  { %p3112_p2 = pnand %p3110_p1, %p3107_p0 }
   0x8   :  { %3115 = shalt.err (!%p3112_p2)
}
   0x9   :  { %s3116_s29 = scalar_lea.vmem %s34_s19, 32  ;;  %p3121_p4 = scmp.lt.s32.totalorder %s34_s19, %s34_s19 }
   0xa   :  { %p3117_p3 = scmp.ne.s32.totalorder %s34_s19, %s3116_s29  ;;  %p3122_p5 = scmp.lt.s32.totalorder %s3116_s29, %s3116_s29 }
   0xc   :  { %p3123_p6 = por %p3122_p5, %p3121_p4 }
   0xe   :  { %p3124_p7 = pnand %p3123_p6, %p3117_p3 }
  0x10   :  { %3127 = shalt.err (!%p3124_p7)
}
  0x11   :  { %36 = dma.hbm_to_vmem [thread:$0]  %s3320_s2, 32, %s34_s19, [#allocation6]  }
  0x12   :  { %s3128_s9 = scalar_lea.hbm %s3319_s1, 37632 }
  0x13   :  { %p3129_p8 = scmp.ne.s32.totalorder %s3319_s1, %s3128_s9  ;;  %p3132_p9 = scmp.lt.u32.totalorder %s3128_s9, %s3319_s1 }
  0x15   :  { %p3134_p10 = pnand %p3132_p9, %p3129_p8 }
  0x17   :  { %3137 = shalt.err (!%p3134_p10)
}
  0x18   :  { %s3138_s14 = scalar_lea.vmem %s3212_s21, 37632  ;;  %p3143_p12 = scmp.lt.s32.totalorder %s3212_s21, %s3212_s21 }
  0x19   :  { %p3139_p11 = scmp.ne.s32.totalorder %s3212_s21, %s3138_s14  ;;  %p3144_p13 = scmp.lt.s32.totalorder %s3138_s14, %s3138_s14 }
  0x1b   :  { %p3145_p0 = por %p3144_p13, %p3143_p12 }
  0x1d   :  { %p3146_p1 = pnand %p3145_p0, %p3139_p11 }
  0x1f   :  { %3149 = shalt.err (!%p3146_p1)
}
  0x20   :  { %s3178_s2 = smov 128   ;;  %s3179_s15 = smov 8  }
  0x21   :  { %26 = dma.hbm_to_vmem [thread:$0]  %s3319_s1, 37632, %s3212_s21, [#allocation4], %s3178_s2, %s3178_s2, %s3179_s15  }
  0x22   :  { %s3180_s18 = smov [#allocation7]   ;;  %s3150_s23 = scalar_lea.hbm %s3321_s3, 32 }
  0x23   :  { %s43_s19 = sshll.u32 %s3180_s18, 4  ;;  %p3151_p2 = scmp.ne.s32.totalorder %s3321_s3, %s3150_s23  ;;  %s44_s19 = int_to_ptr.vmem [resolvable:$true] %s43_s19 }
  0x24   :  { %p3154_p3 = scmp.lt.u32.totalorder %s3150_s23, %s3321_s3 }
  0x26   :  { %p3156_p4 = pnand %p3154_p3, %p3151_p2 }
  0x28   :  { %3159 = shalt.err (!%p3156_p4)
}
  0x29   :  { %s3160_s28 = scalar_lea.vmem %s44_s19, 32  ;;  %p3165_p6 = scmp.lt.s32.totalorder %s44_s19, %s44_s19 }
  0x2a   :  { %p3161_p5 = scmp.ne.s32.totalorder %s44_s19, %s3160_s28  ;;  %p3166_p7 = scmp.lt.s32.totalorder %s3160_s28, %s3160_s28 }
  0x2c   :  { %p3167_p8 = por %p3166_p7, %p3165_p6 }
  0x2e   :  { %p3168_p9 = pnand %p3167_p8, %p3161_p5 }
  0x30   :  { %3171 = shalt.err (!%p3168_p9)
}
  0x31   :  { %46 = dma.hbm_to_vmem [thread:$0]  %s3321_s3, 32, %s44_s19, [#allocation6]  }
  0x32   :  { %3172 = dma.done.wait [#allocation4], 37632  }
  0x33   :  { %3173 = vsyncadd [#allocation4], 4294929664 }
  0x34   :  { %3174 = dma.done.wait [#allocation6], 64  }
  0x35   :  { %3175 = vsyncadd [#allocation6], 4294967232  ;;  %v2661_v0 = vld [vmem:[#allocation3 + $0x4] ss:$8 sps:$4 sm:$0xff]   ;;  %v2665_v2 = vld [vmem:[#allocation3] ss:$8 sps:$4 sm:$0xff]  }
  0x36   :  { %v2663_v1 = vld [vmem:[#allocation3 + $0x504] ss:$8 sps:$4 sm:$0xff]   ;;  %1877 = vmatprep.subr.bf16.mxu1 %v2661_v0  ;;  %v2666_v3 = vld [vmem:[#allocation3 + $0x500] ss:$8 sps:$4 sm:$0xff]   ;;  %v2667_v4 = vld [vmem:[#allocation3 + $0x14] ss:$8 sps:$4 sm:$0xff]  }
  0x37   :  { %2082 = vmatprep.subr.bf16.mxu0 %v2663_v1  ;;  %1878 = vmatpush1.bf16.msra.mxu1 %v2665_v2  ;;  %v2669_v5 = vld [vmem:[#allocation3 + $0x514] ss:$8 sps:$4 sm:$0xff]   ;;  %v2671_v6 = vld [vmem:[#allocation3 + $0x10] ss:$8 sps:$4 sm:$0xff]   ;;  %v2673_v8 = vld [vmem:[#allocation3 + $0x24] ss:$8 sps:$4 sm:$0xff]  }
  0x38   :  { %2083 = vmatpush1.bf16.msra.mxu0 %v2666_v3  ;;  %1879 = vmatprep.subr.bf16.mxu1 %v2667_v4  ;;  %v2672_v7 = vld [vmem:[#allocation3 + $0x510] ss:$8 sps:$4 sm:$0xff]   ;;  %v2675_v9 = vld [vmem:[#allocation3 + $0x524] ss:$8 sps:$4 sm:$0xff]   ;;  %v2677_v10 = vld [vmem:[#allocation3 + $0x20] ss:$8 sps:$4 sm:$0xff]  }
  0x39   :  { %2084 = vmatprep.subr.bf16.mxu0 %v2669_v5  ;;  %v2678_v11 = vld [vmem:[#allocation3 + $0x520] ss:$8 sps:$4 sm:$0xff]   ;;  %v2679_v12 = vld [vmem:[#allocation3 + $0x34] ss:$8 sps:$4 sm:$0xff]   ;;  %v2683_v14 = vld [vmem:[#allocation3 + $0x30] ss:$8 sps:$4 sm:$0xff]  }
  0x3a   :  { %v2681_v13 = vld [vmem:[#allocation3 + $0x534] ss:$8 sps:$4 sm:$0xff]   ;;  %v2684_v15 = vld [vmem:[#allocation3 + $0x530] ss:$8 sps:$4 sm:$0xff]   ;;  %v2685_v16 = vld [vmem:[#allocation3 + $0x44] ss:$8 sps:$4 sm:$0xff]  }
  0x3b   :  { %1880 = vmatpush1.bf16.msra.mxu1 %v2671_v6  ;;  %v2687_v17 = vld [vmem:[#allocation3 + $0x544] ss:$8 sps:$4 sm:$0xff]   ;;  %v2689_v18 = vld [vmem:[#allocation3 + $0x40] ss:$8 sps:$4 sm:$0xff]   ;;  %v2691_v20 = vld [vmem:[#allocation3 + $0x54] ss:$8 sps:$4 sm:$0xff]  }
  0x3c   :  { %2085 = vmatpush1.bf16.msra.mxu0 %v2672_v7  ;;  %1881 = vmatprep.subr.bf16.mxu1 %v2673_v8  ;;  %v2690_v19 = vld [vmem:[#allocation3 + $0x540] ss:$8 sps:$4 sm:$0xff]   ;;  %v2693_v21 = vld [vmem:[#allocation3 + $0x554] ss:$8 sps:$4 sm:$0xff]   ;;  %v2695_v22 = vld [vmem:[#allocation3 + $0x50] ss:$8 sps:$4 sm:$0xff]  }
  0x3d   :  { %2086 = vmatprep.subr.bf16.mxu0 %v2675_v9  ;;  %v2696_v23 = vld [vmem:[#allocation3 + $0x550] ss:$8 sps:$4 sm:$0xff]   ;;  %v2697_v24 = vld [vmem:[#allocation3 + $0x64] ss:$8 sps:$4 sm:$0xff]   ;;  %v2701_v26 = vld [vmem:[#allocation3 + $0x60] ss:$8 sps:$4 sm:$0xff]  }
  0x3e   :  { %v2699_v25 = vld [vmem:[#allocation3 + $0x564] ss:$8 sps:$4 sm:$0xff]   ;;  %v2702_v27 = vld [vmem:[#allocation3 + $0x560] ss:$8 sps:$4 sm:$0xff]   ;;  %v2703_v28 = vld [vmem:[#allocation3 + $0x74] ss:$8 sps:$4 sm:$0xff]  }
  0x3f   :  { %1882 = vmatpush1.bf16.msra.mxu1 %v2677_v10  ;;  %v2705_v29 = vld [vmem:[#allocation3 + $0x574] ss:$8 sps:$4 sm:$0xff]   ;;  %v2707_v30 = vld [vmem:[#allocation3 + $0x70] ss:$8 sps:$4 sm:$0xff]   ;;  %v2709_v32 = vld [vmem:[#allocation3 + $0x84] ss:$8 sps:$4 sm:$0xff]  }
  0x40   :  { %2087 = vmatpush1.bf16.msra.mxu0 %v2678_v11  ;;  %1883 = vmatprep.subr.bf16.mxu1 %v2679_v12  ;;  %v2708_v31 = vld [vmem:[#allocation3 + $0x570] ss:$8 sps:$4 sm:$0xff]   ;;  %v2711_v33 = vld [vmem:[#allocation3 + $0x584] ss:$8 sps:$4 sm:$0xff]   ;;  %v2713_v34 = vld [vmem:[#allocation3 + $0x80] ss:$8 sps:$4 sm:$0xff]  }
  0x41   :  { %2088 = vmatprep.subr.bf16.mxu0 %v2681_v13  ;;  %v2714_v35 = vld [vmem:[#allocation3 + $0x580] ss:$8 sps:$4 sm:$0xff]   ;;  %v2715_v36 = vld [vmem:[#allocation3 + $0x94] ss:$8 sps:$4 sm:$0xff]   ;;  %v2719_v38 = vld [vmem:[#allocation3 + $0x90] ss:$8 sps:$4 sm:$0xff]  }
  0x42   :  { %v2717_v37 = vld [vmem:[#allocation3 + $0x594] ss:$8 sps:$4 sm:$0xff]   ;;  %v2720_v39 = vld [vmem:[#allocation3 + $0x590] ss:$8 sps:$4 sm:$0xff]   ;;  %v2721_v40 = vld [vmem:[#allocation3 + $0xa4] ss:$8 sps:$4 sm:$0xff]  }
  0x43   :  { %1884 = vmatpush1.bf16.msra.mxu1 %v2683_v14  ;;  %v2723_v41 = vld [vmem:[#allocation3 + $0x5a4] ss:$8 sps:$4 sm:$0xff]   ;;  %v2725_v42 = vld [vmem:[#allocation3 + $0xa0] ss:$8 sps:$4 sm:$0xff]   ;;  %v2727_v44 = vld [vmem:[#allocation3 + $0xb4] ss:$8 sps:$4 sm:$0xff]  }
  0x44   :  { %2089 = vmatpush1.bf16.msra.mxu0 %v2684_v15  ;;  %1885 = vmatprep.subr.bf16.mxu1 %v2685_v16  ;;  %v2726_v43 = vld [vmem:[#allocation3 + $0x5a0] ss:$8 sps:$4 sm:$0xff]   ;;  %v2729_v45 = vld [vmem:[#allocation3 + $0x5b4] ss:$8 sps:$4 sm:$0xff]   ;;  %v2731_v47 = vld [vmem:[#allocation3 + $0xb0] ss:$8 sps:$4 sm:$0xff]  }
  0x45   :  { %2090 = vmatprep.subr.bf16.mxu0 %v2687_v17  ;;  %v60_v46 = vld [vmem:[%s3318_s0 + $0x8] sm:$0xff]  ;;  %v2732_v49 = vld [vmem:[#allocation3 + $0x5b0] ss:$8 sps:$4 sm:$0xff]   ;;  %v2739_v56 = vld [vmem:[#allocation3 + $0xd4] ss:$8 sps:$4 sm:$0xff]   ;;  %vm1873_vm0 = vcmask 392192  }
  0x46   :  { %v79_v48 = vpack.c.bf16 %v60_v46, %v60_v46  ;;  %v70_v50 = vld [vmem:[%s3318_s0 + $0x58] sm:$0xff]  ;;  %v2733_v51 = vld [vmem:[#allocation3 + $0xc4] ss:$8 sps:$4 sm:$0xff]   ;;  %v2737_v54 = vld [vmem:[#allocation3 + $0xc0] ss:$8 sps:$4 sm:$0xff]   ;;  %vm2315_vm1 = vcmask 7168  }
  0x47   :  { %1886 = vmatpush1.bf16.msra.mxu1 %v2689_v18  ;;  %v2735_v52 = vld [vmem:[#allocation3 + $0x5c4] ss:$8 sps:$4 sm:$0xff]   ;;  %v89_v53 = vpack.c.bf16 %v70_v50, %v70_v50  ;;  %v2738_v55 = vld [vmem:[#allocation3 + $0x5c0] ss:$8 sps:$4 sm:$0xff]   ;;  %v2741_v57 = vld [vmem:[#allocation3 + $0x5d4] ss:$8 sps:$4 sm:$0xff]  }
  0x48   :  { %2091 = vmatpush1.bf16.msra.mxu0 %v2690_v19  ;;  %1887 = vmatprep.subr.bf16.mxu1 %v2691_v20  ;;  %v2743_v58 = vld [vmem:[#allocation3 + $0xd0] ss:$8 sps:$4 sm:$0xff]   ;;  %v2745_v60 = vld [vmem:[#allocation3 + $0xe4] ss:$8 sps:$4 sm:$0xff]   ;;  %v2749_v62 = vld [vmem:[#allocation3 + $0xe0] ss:$8 sps:$4 sm:$0xff]  }
  0x49   :  { %2092 = vmatprep.subr.bf16.mxu0 %v2693_v21  ;;  %1909 = vmatprep.mubr.bf16.mxu1 %v79_v48  ;;  %v2744_v59 = vld [vmem:[#allocation3 + $0x5d0] ss:$8 sps:$4 sm:$0xff]   ;;  %v2747_v61 = vld [vmem:[#allocation3 + $0x5e4] ss:$8 sps:$4 sm:$0xff]   ;;  %v2750_v63 = vld [vmem:[#allocation3 + $0x5e0] ss:$8 sps:$4 sm:$0xff]  }
  0x4a   :  { %2114 = vmatprep.mubr.bf16.mxu0 %v89_v53  ;;  %v2751_v0 = vld [vmem:[#allocation3 + $0xf4] ss:$8 sps:$4 sm:$0xff]   ;;  %v2755_v2 = vld [vmem:[#allocation3 + $0xf0] ss:$8 sps:$4 sm:$0xff]   ;;  %v2759_v4 = vld [vmem:[#allocation3 + $0x104] ss:$8 sps:$4 sm:$0xff]  }
  0x4b   :  { %1888 = vmatpush1.bf16.msra.mxu1 %v2695_v22  ;;  %v2753_v1 = vld [vmem:[#allocation3 + $0x5f4] ss:$8 sps:$4 sm:$0xff]   ;;  %v2756_v3 = vld [vmem:[#allocation3 + $0x5f0] ss:$8 sps:$4 sm:$0xff]   ;;  %v59_v5 = vld [vmem:[%s3318_s0] sm:$0xff] }
  0x4c   :  { %2093 = vmatpush1.bf16.msra.mxu0 %v2696_v23  ;;  %1889 = vmatprep.subr.bf16.mxu1 %v2697_v24  ;;  %v69_v6 = vld [vmem:[%s3318_s0 + $0x50] sm:$0xff]  ;;  %v2762_v7 = vld [vmem:[#allocation3 + $0x604] ss:$8 sps:$4 sm:$0xff]   ;;  %v2757_v8 = vld [vmem:[#allocation3 + $0x100] ss:$8 sps:$4 sm:$0xff]   ;;  %v78_v10 = vpack.c.bf16 %v59_v5, %v59_v5 }
  0x4d   :  { %2094 = vmatprep.subr.bf16.mxu0 %v2699_v25  ;;  %v2760_v9 = vld [vmem:[#allocation3 + $0x600] ss:$8 sps:$4 sm:$0xff]   ;;  %v88_v11 = vpack.c.bf16 %v69_v6, %v69_v6  ;;  %v2765_v12 = vld [vmem:[#allocation3 + $0x114] ss:$8 sps:$4 sm:$0xff]   ;;  %v2763_v14 = vld [vmem:[#allocation3 + $0x110] ss:$8 sps:$4 sm:$0xff]  }
  0x4e   :  { %v2768_v13 = vld [vmem:[#allocation3 + $0x614] ss:$8 sps:$4 sm:$0xff]   ;;  %v2766_v15 = vld [vmem:[#allocation3 + $0x610] ss:$8 sps:$4 sm:$0xff]   ;;  %v2771_v16 = vld [vmem:[#allocation3 + $0x124] ss:$8 sps:$4 sm:$0xff]  }
  0x4f   :  { %1890 = vmatpush1.bf16.msra.mxu1 %v2701_v26  ;;  %v2774_v17 = vld [vmem:[#allocation3 + $0x624] ss:$8 sps:$4 sm:$0xff]   ;;  %v2769_v18 = vld [vmem:[#allocation3 + $0x120] ss:$8 sps:$4 sm:$0xff]   ;;  %v2777_v20 = vld [vmem:[#allocation3 + $0x134] ss:$8 sps:$4 sm:$0xff]  }
  0x50   :  { %2095 = vmatpush1.bf16.msra.mxu0 %v2702_v27  ;;  %1891 = vmatprep.subr.bf16.mxu1 %v2703_v28  ;;  %v2772_v19 = vld [vmem:[#allocation3 + $0x620] ss:$8 sps:$4 sm:$0xff]   ;;  %v2780_v21 = vld [vmem:[#allocation3 + $0x634] ss:$8 sps:$4 sm:$0xff]   ;;  %v2775_v22 = vld [vmem:[#allocation3 + $0x130] ss:$8 sps:$4 sm:$0xff]  }
  0x51   :  { %2096 = vmatprep.subr.bf16.mxu0 %v2705_v29  ;;  %v2778_v23 = vld [vmem:[#allocation3 + $0x630] ss:$8 sps:$4 sm:$0xff]   ;;  %v2783_v24 = vld [vmem:[#allocation3 + $0x144] ss:$8 sps:$4 sm:$0xff]   ;;  %v2781_v26 = vld [vmem:[#allocation3 + $0x140] ss:$8 sps:$4 sm:$0xff]  }
  0x52   :  { %v2786_v25 = vld [vmem:[#allocation3 + $0x644] ss:$8 sps:$4 sm:$0xff]   ;;  %v2784_v27 = vld [vmem:[#allocation3 + $0x640] ss:$8 sps:$4 sm:$0xff]   ;;  %v2789_v28 = vld [vmem:[#allocation3 + $0x154] ss:$8 sps:$4 sm:$0xff]  }
  0x53   :  { %1892 = vmatpush1.bf16.msra.mxu1 %v2707_v30  ;;  %v2792_v29 = vld [vmem:[#allocation3 + $0x654] ss:$8 sps:$4 sm:$0xff]   ;;  %v2787_v30 = vld [vmem:[#allocation3 + $0x150] ss:$8 sps:$4 sm:$0xff]   ;;  %v2805_v46 = vld [vmem:[#allocation3 + $0x180] ss:$8 sps:$4 sm:$0xff]  }
  0x54   :  { %2097 = vmatpush1.bf16.msra.mxu0 %v2708_v31  ;;  %1893 = vmatprep.subr.bf16.mxu1 %v2709_v32  ;;  %v2790_v31 = vld [vmem:[#allocation3 + $0x650] ss:$8 sps:$4 sm:$0xff]   ;;  %v2795_v32 = vld [vmem:[#allocation3 + $0x164] ss:$8 sps:$4 sm:$0xff]   ;;  %v2813_v48 = vld [vmem:[#allocation3 + $0x194] ss:$8 sps:$4 sm:$0xff]  }
  0x55   :  { %2098 = vmatprep.subr.bf16.mxu0 %v2711_v33  ;;  %v2798_v33 = vld [vmem:[#allocation3 + $0x664] ss:$8 sps:$4 sm:$0xff]   ;;  %v2811_v50 = vld [vmem:[#allocation3 + $0x190] ss:$8 sps:$4 sm:$0xff]   ;;  %v2841_v6 = vld [vmem:[#allocation3 + $0x1e0] ss:$8 sps:$4 sm:$0xff]  }
  0x56   :  { %v2822_v53 = vld [vmem:[#allocation3 + $0x6a4] ss:$8 sps:$4 sm:$0xff]  }
  0x57   :  { %1894 = vmatpush1.bf16.msra.mxu1 %v2713_v34  ;;  %v62_v34 = vld [vmem:[%s3318_s0 + $0x18] sm:$0xff]  ;;  %v2846_v5 = vld [vmem:[#allocation3 + $0x6e4] ss:$8 sps:$4 sm:$0xff]  }
  0x58   :  { %2099 = vmatpush1.bf16.msra.mxu0 %v2714_v35  ;;  %1895 = vmatprep.subr.bf16.mxu1 %v2715_v36  ;;  %v2793_v35 = vld [vmem:[#allocation3 + $0x160] ss:$8 sps:$4 sm:$0xff]   ;;  %v81_v36 = vpack.c.bf16 %v62_v34, %v62_v34  ;;  %v2871_v34 = vld [vmem:[#allocation3 + $0x230] ss:$8 sps:$4 sm:$0xff]  }
  0x59   :  { %2100 = vmatprep.subr.bf16.mxu0 %v2717_v37  ;;  %v2796_v37 = vld [vmem:[#allocation3 + $0x660] ss:$8 sps:$4 sm:$0xff]  }
  0x5b   :  { %1896 = vmatpush1.bf16.msra.mxu1 %v2719_v38  ;;  %v72_v38 = vld [vmem:[%s3318_s0 + $0x68] sm:$0xff] }
  0x5c   :  { %2101 = vmatpush1.bf16.msra.mxu0 %v2720_v39  ;;  %1897 = vmatprep.subr.bf16.mxu1 %v2721_v40  ;;  %v2801_v39 = vld [vmem:[#allocation3 + $0x174] ss:$8 sps:$4 sm:$0xff]  }
  0x5d   :  { %2102 = vmatprep.subr.bf16.mxu0 %v2723_v41  ;;  %v2804_v40 = vld [vmem:[#allocation3 + $0x674] ss:$8 sps:$4 sm:$0xff]   ;;  %v91_v41 = vpack.c.bf16 %v72_v38, %v72_v38  ;;  %v2877_v38 = vld [vmem:[#allocation3 + $0x240] ss:$8 sps:$4 sm:$0xff]  }
  0x5f   :  { %1898 = vmatpush1.bf16.msra.mxu1 %v2725_v42  ;;  %v2799_v42 = vld [vmem:[#allocation3 + $0x170] ss:$8 sps:$4 sm:$0xff]  }
  0x60   :  { %2103 = vmatpush1.bf16.msra.mxu0 %v2726_v43  ;;  %1899 = vmatprep.subr.bf16.mxu1 %v2727_v44  ;;  %v2802_v43 = vld [vmem:[#allocation3 + $0x670] ss:$8 sps:$4 sm:$0xff]   ;;  %v2807_v44 = vld [vmem:[#allocation3 + $0x184] ss:$8 sps:$4 sm:$0xff]  }
  0x61   :  { %2104 = vmatprep.subr.bf16.mxu0 %v2729_v45  ;;  %v2810_v45 = vld [vmem:[#allocation3 + $0x684] ss:$8 sps:$4 sm:$0xff]  }
  0x63   :  { %1900 = vmatpush1.bf16.msra.mxu1 %v2731_v47  ;;  %v2808_v47 = vld [vmem:[#allocation3 + $0x680] ss:$8 sps:$4 sm:$0xff]  }
  0x64   :  { %2105 = vmatpush1.bf16.msra.mxu0 %v2732_v49  ;;  %1901 = vmatprep.subr.bf16.mxu1 %v2733_v51  ;;  %v2816_v49 = vld [vmem:[#allocation3 + $0x694] ss:$8 sps:$4 sm:$0xff]   ;;  %v2814_v51 = vld [vmem:[#allocation3 + $0x690] ss:$8 sps:$4 sm:$0xff]  }
  0x65   :  { %2106 = vmatprep.subr.bf16.mxu0 %v2735_v52  ;;  %v2819_v52 = vld [vmem:[#allocation3 + $0x1a4] ss:$8 sps:$4 sm:$0xff]  }
  0x67   :  { %1902 = vmatpush1.bf16.msra.mxu1 %v2737_v54  ;;  %v2817_v54 = vld [vmem:[#allocation3 + $0x1a0] ss:$8 sps:$4 sm:$0xff]  }
  0x68   :  { %2107 = vmatpush1.bf16.msra.mxu0 %v2738_v55  ;;  %1903 = vmatprep.subr.bf16.mxu1 %v2739_v56  ;;  %v2820_v55 = vld [vmem:[#allocation3 + $0x6a0] ss:$8 sps:$4 sm:$0xff]   ;;  %v2825_v56 = vld [vmem:[#allocation3 + $0x1b4] ss:$8 sps:$4 sm:$0xff]  }
  0x69   :  { %2108 = vmatprep.subr.bf16.mxu0 %v2741_v57  ;;  %v2828_v57 = vld [vmem:[#allocation3 + $0x6b4] ss:$8 sps:$4 sm:$0xff]  }
  0x6b   :  { %1904 = vmatpush1.bf16.msra.mxu1 %v2743_v58  ;;  %v2823_v58 = vld [vmem:[#allocation3 + $0x1b0] ss:$8 sps:$4 sm:$0xff]  }
  0x6c   :  { %2109 = vmatpush1.bf16.msra.mxu0 %v2744_v59  ;;  %1905 = vmatprep.subr.bf16.mxu1 %v2745_v60  ;;  %v2826_v59 = vld [vmem:[#allocation3 + $0x6b0] ss:$8 sps:$4 sm:$0xff]   ;;  %v2831_v60 = vld [vmem:[#allocation3 + $0x1c4] ss:$8 sps:$4 sm:$0xff]  }
  0x6d   :  { %2110 = vmatprep.subr.bf16.mxu0 %v2747_v61  ;;  %v2834_v61 = vld [vmem:[#allocation3 + $0x6c4] ss:$8 sps:$4 sm:$0xff]  }
  0x6f   :  { %1906 = vmatpush1.bf16.msra.mxu1 %v2749_v62  ;;  %v2829_v62 = vld [vmem:[#allocation3 + $0x1c0] ss:$8 sps:$4 sm:$0xff]  }
  0x70   :  { %2111 = vmatpush1.bf16.msra.mxu0 %v2750_v63  ;;  %1907 = vmatprep.subr.bf16.mxu1 %v2751_v0  ;;  %v2832_v63 = vld [vmem:[#allocation3 + $0x6c0] ss:$8 sps:$4 sm:$0xff]   ;;  %v2837_v0 = vld [vmem:[#allocation3 + $0x1d4] ss:$8 sps:$4 sm:$0xff]  }
  0x71   :  { %2112 = vmatprep.subr.bf16.mxu0 %v2753_v1  ;;  %v2840_v1 = vld [vmem:[#allocation3 + $0x6d4] ss:$8 sps:$4 sm:$0xff]  }
  0x73   :  { %1908 = vmatpush1.bf16.msra.mxu1 %v2755_v2  ;;  %v2835_v2 = vld [vmem:[#allocation3 + $0x1d0] ss:$8 sps:$4 sm:$0xff]  }
  0x74   :  { %2113 = vmatpush1.bf16.msra.mxu0 %v2756_v3  ;;  %1918 = vmatprep.subr.bf16.mxu1 %v2759_v4  ;;  %v2838_v3 = vld [vmem:[#allocation3 + $0x6d0] ss:$8 sps:$4 sm:$0xff]   ;;  %v2843_v4 = vld [vmem:[#allocation3 + $0x1e4] ss:$8 sps:$4 sm:$0xff]  }
  0x75   :  { %2123 = vmatprep.subr.bf16.mxu0 %v2762_v7  ;;  %v2844_v7 = vld [vmem:[#allocation3 + $0x6e0] ss:$8 sps:$4 sm:$0xff]  }
  0x76   :  { %1910 = vmatmul.mubr.bf16.vlgmr.msra.gmra.mrb[0].mxu1 %v78_v10  ;;  %v2847_v10 = vld [vmem:[#allocation3 + $0x1f0] ss:$8 sps:$4 sm:$0xff]  }
  0x77   :  { %2115 = vmatmul.mubr.bf16.vlgmr.msra.gmra.mrb[0].mxu0 %v88_v11  ;;  %1919 = vmatpush1.bf16.msra.mxu1 %v2757_v8  ;;  %v2849_v8 = vld [vmem:[#allocation3 + $0x1f4] ss:$8 sps:$4 sm:$0xff]   ;;  %v2850_v11 = vld [vmem:[#allocation3 + $0x6f0] ss:$8 sps:$4 sm:$0xff]  }
  0x78   :  { %2124 = vmatpush1.bf16.msra.mxu0 %v2760_v9  ;;  %1920 = vmatprep.subr.bf16.mxu1 %v2765_v12  ;;  %v2852_v9 = vld [vmem:[#allocation3 + $0x6f4] ss:$8 sps:$4 sm:$0xff]   ;;  %v2855_v12 = vld [vmem:[#allocation3 + $0x204] ss:$8 sps:$4 sm:$0xff]  }
  0x79   :  { %2125 = vmatprep.subr.bf16.mxu0 %v2768_v13  ;;  %1950 = vmatprep.mubr.bf16.mxu1 %v81_v36  ;;  %v61_v13 = vld [vmem:[%s3318_s0 + $0x10] sm:$0xff]  ;;  %v2879_v36 = vld [vmem:[#allocation3 + $0x244] ss:$8 sps:$4 sm:$0xff]  }
  0x7a   :  { %2155 = vmatprep.mubr.bf16.mxu0 %v91_v41  ;;  %v2888_v41 = vld [vmem:[#allocation3 + $0x754] ss:$8 sps:$4 sm:$0xff]  }
  0x7b   :  { %1921 = vmatpush1.bf16.msra.mxu1 %v2763_v14  ;;  %v71_v14 = vld [vmem:[%s3318_s0 + $0x60] sm:$0xff] }
  0x7c   :  { %2126 = vmatpush1.bf16.msra.mxu0 %v2766_v15  ;;  %1922 = vmatprep.subr.bf16.mxu1 %v2771_v16  ;;  %v2858_v15 = vld [vmem:[#allocation3 + $0x704] ss:$8 sps:$4 sm:$0xff]   ;;  %v2853_v16 = vld [vmem:[#allocation3 + $0x200] ss:$8 sps:$4 sm:$0xff]  }
  0x7d   :  { %2127 = vmatprep.subr.bf16.mxu0 %v2774_v17  ;;  %v2856_v17 = vld [vmem:[#allocation3 + $0x700] ss:$8 sps:$4 sm:$0xff]  }
  0x7f   :  { %1923 = vmatpush1.bf16.msra.mxu1 %v2769_v18  ;;  %v80_v18 = vpack.c.bf16 %v61_v13, %v61_v13  ;;  %v2942_v13 = vld [vmem:[#allocation3 + $0x7e4] ss:$8 sps:$4 sm:$0xff]  }
  0x80   :  { %2128 = vmatpush1.bf16.msra.mxu0 %v2772_v19  ;;  %1924 = vmatprep.subr.bf16.mxu1 %v2777_v20  ;;  %v90_v19 = vpack.c.bf16 %v71_v14, %v71_v14  ;;  %v2861_v20 = vld [vmem:[#allocation3 + $0x214] ss:$8 sps:$4 sm:$0xff]   ;;  %v2937_v14 = vld [vmem:[#allocation3 + $0x2e0] ss:$8 sps:$4 sm:$0xff]  }
  0x81   :  { %2129 = vmatprep.subr.bf16.mxu0 %v2780_v21  ;;  %v2864_v21 = vld [vmem:[#allocation3 + $0x714] ss:$8 sps:$4 sm:$0xff]  }
  0x83   :  { %1925 = vmatpush1.bf16.msra.mxu1 %v2775_v22  ;;  %v64_v22 = vld [vmem:[%s3318_s0 + $0x28] sm:$0xff] }
  0x84   :  { %2130 = vmatpush1.bf16.msra.mxu0 %v2778_v23  ;;  %1926 = vmatprep.subr.bf16.mxu1 %v2783_v24  ;;  %v2859_v23 = vld [vmem:[#allocation3 + $0x210] ss:$8 sps:$4 sm:$0xff]   ;;  %v83_v24 = vpack.c.bf16 %v64_v22, %v64_v22  ;;  %v2951_v22 = vld [vmem:[#allocation3 + $0x304] ss:$8 sps:$4 sm:$0xff]  }
  0x85   :  { %2131 = vmatprep.subr.bf16.mxu0 %v2786_v25  ;;  %v2862_v25 = vld [vmem:[#allocation3 + $0x710] ss:$8 sps:$4 sm:$0xff]  }
  0x87   :  { %1927 = vmatpush1.bf16.msra.mxu1 %v2781_v26  ;;  %v74_v26 = vld [vmem:[%s3318_s0 + $0x78] sm:$0xff] }
  0x88   :  { %2132 = vmatpush1.bf16.msra.mxu0 %v2784_v27  ;;  %1928 = vmatprep.subr.bf16.mxu1 %v2789_v28  ;;  %v2867_v27 = vld [vmem:[#allocation3 + $0x224] ss:$8 sps:$4 sm:$0xff]  }
  0x89   :  { %2133 = vmatprep.subr.bf16.mxu0 %v2792_v29  ;;  %v2870_v28 = vld [vmem:[#allocation3 + $0x724] ss:$8 sps:$4 sm:$0xff]   ;;  %v93_v29 = vpack.c.bf16 %v74_v26, %v74_v26 }
  0x8b   :  { %1929 = vmatpush1.bf16.msra.mxu1 %v2787_v30  ;;  %v2865_v30 = vld [vmem:[#allocation3 + $0x220] ss:$8 sps:$4 sm:$0xff]  }
  0x8c   :  { %2134 = vmatpush1.bf16.msra.mxu0 %v2790_v31  ;;  %1930 = vmatprep.subr.bf16.mxu1 %v2795_v32  ;;  %v2868_v31 = vld [vmem:[#allocation3 + $0x720] ss:$8 sps:$4 sm:$0xff]   ;;  %v2873_v32 = vld [vmem:[#allocation3 + $0x234] ss:$8 sps:$4 sm:$0xff]  }
  0x8d   :  { %2135 = vmatprep.subr.bf16.mxu0 %v2798_v33  ;;  %v2876_v33 = vld [vmem:[#allocation3 + $0x734] ss:$8 sps:$4 sm:$0xff]  }
  0x8f   :  { %1931 = vmatpush1.bf16.msra.mxu1 %v2793_v35  ;;  %v2874_v35 = vld [vmem:[#allocation3 + $0x730] ss:$8 sps:$4 sm:$0xff]  }
  0x90   :  { %2136 = vmatpush1.bf16.msra.mxu0 %v2796_v37  ;;  %1932 = vmatprep.subr.bf16.mxu1 %v2801_v39  ;;  %v2882_v37 = vld [vmem:[#allocation3 + $0x744] ss:$8 sps:$4 sm:$0xff]   ;;  %v2880_v39 = vld [vmem:[#allocation3 + $0x740] ss:$8 sps:$4 sm:$0xff]  }
  0x91   :  { %2137 = vmatprep.subr.bf16.mxu0 %v2804_v40  ;;  %v2885_v40 = vld [vmem:[#allocation3 + $0x254] ss:$8 sps:$4 sm:$0xff]  }
  0x93   :  { %1933 = vmatpush1.bf16.msra.mxu1 %v2799_v42  ;;  %v2883_v42 = vld [vmem:[#allocation3 + $0x250] ss:$8 sps:$4 sm:$0xff]  }
  0x94   :  { %2138 = vmatpush1.bf16.msra.mxu0 %v2802_v43  ;;  %1934 = vmatprep.subr.bf16.mxu1 %v2807_v44  ;;  %v2886_v43 = vld [vmem:[#allocation3 + $0x750] ss:$8 sps:$4 sm:$0xff]   ;;  %v2891_v44 = vld [vmem:[#allocation3 + $0x264] ss:$8 sps:$4 sm:$0xff]  }
  0x95   :  { %2139 = vmatprep.subr.bf16.mxu0 %v2810_v45  ;;  %v2894_v45 = vld [vmem:[#allocation3 + $0x764] ss:$8 sps:$4 sm:$0xff]  }
  0x97   :  { %1935 = vmatpush1.bf16.msra.mxu1 %v2805_v46  ;;  %v2889_v46 = vld [vmem:[#allocation3 + $0x260] ss:$8 sps:$4 sm:$0xff]  }
  0x98   :  { %2140 = vmatpush1.bf16.msra.mxu0 %v2808_v47  ;;  %1936 = vmatprep.subr.bf16.mxu1 %v2813_v48  ;;  %v2892_v47 = vld [vmem:[#allocation3 + $0x760] ss:$8 sps:$4 sm:$0xff]   ;;  %v2897_v48 = vld [vmem:[#allocation3 + $0x274] ss:$8 sps:$4 sm:$0xff]  }
  0x99   :  { %2141 = vmatprep.subr.bf16.mxu0 %v2816_v49  ;;  %v2900_v49 = vld [vmem:[#allocation3 + $0x774] ss:$8 sps:$4 sm:$0xff]  }
  0x9b   :  { %1937 = vmatpush1.bf16.msra.mxu1 %v2811_v50  ;;  %v2895_v50 = vld [vmem:[#allocation3 + $0x270] ss:$8 sps:$4 sm:$0xff]  }
  0x9c   :  { %2142 = vmatpush1.bf16.msra.mxu0 %v2814_v51  ;;  %1938 = vmatprep.subr.bf16.mxu1 %v2819_v52  ;;  %v2898_v51 = vld [vmem:[#allocation3 + $0x770] ss:$8 sps:$4 sm:$0xff]   ;;  %v2903_v52 = vld [vmem:[#allocation3 + $0x284] ss:$8 sps:$4 sm:$0xff]  }
  0x9d   :  { %2143 = vmatprep.subr.bf16.mxu0 %v2822_v53  ;;  %v2906_v53 = vld [vmem:[#allocation3 + $0x784] ss:$8 sps:$4 sm:$0xff]  }
  0x9f   :  { %1939 = vmatpush1.bf16.msra.mxu1 %v2817_v54  ;;  %v2901_v54 = vld [vmem:[#allocation3 + $0x280] ss:$8 sps:$4 sm:$0xff]  }
  0xa0   :  { %2144 = vmatpush1.bf16.msra.mxu0 %v2820_v55  ;;  %1940 = vmatprep.subr.bf16.mxu1 %v2825_v56  ;;  %v2904_v55 = vld [vmem:[#allocation3 + $0x780] ss:$8 sps:$4 sm:$0xff]   ;;  %v2909_v56 = vld [vmem:[#allocation3 + $0x294] ss:$8 sps:$4 sm:$0xff]  }
  0xa1   :  { %2145 = vmatprep.subr.bf16.mxu0 %v2828_v57  ;;  %v2912_v57 = vld [vmem:[#allocation3 + $0x794] ss:$8 sps:$4 sm:$0xff]  }
  0xa3   :  { %1941 = vmatpush1.bf16.msra.mxu1 %v2823_v58  ;;  %v2907_v58 = vld [vmem:[#allocation3 + $0x290] ss:$8 sps:$4 sm:$0xff]  }
  0xa4   :  { %2146 = vmatpush1.bf16.msra.mxu0 %v2826_v59  ;;  %1942 = vmatprep.subr.bf16.mxu1 %v2831_v60  ;;  %v2910_v59 = vld [vmem:[#allocation3 + $0x790] ss:$8 sps:$4 sm:$0xff]   ;;  %v2915_v60 = vld [vmem:[#allocation3 + $0x2a4] ss:$8 sps:$4 sm:$0xff]  }
  0xa5   :  { %2147 = vmatprep.subr.bf16.mxu0 %v2834_v61  ;;  %v2918_v61 = vld [vmem:[#allocation3 + $0x7a4] ss:$8 sps:$4 sm:$0xff]  }
  0xa7   :  { %1943 = vmatpush1.bf16.msra.mxu1 %v2829_v62  ;;  %v2913_v62 = vld [vmem:[#allocation3 + $0x2a0] ss:$8 sps:$4 sm:$0xff]  }
  0xa8   :  { %2148 = vmatpush1.bf16.msra.mxu0 %v2832_v63  ;;  %1944 = vmatprep.subr.bf16.mxu1 %v2837_v0  ;;  %v2916_v63 = vld [vmem:[#allocation3 + $0x7a0] ss:$8 sps:$4 sm:$0xff]   ;;  %v2921_v0 = vld [vmem:[#allocation3 + $0x2b4] ss:$8 sps:$4 sm:$0xff]  }
  0xa9   :  { %2149 = vmatprep.subr.bf16.mxu0 %v2840_v1  ;;  %v2924_v1 = vld [vmem:[#allocation3 + $0x7b4] ss:$8 sps:$4 sm:$0xff]  }
  0xab   :  { %1945 = vmatpush1.bf16.msra.mxu1 %v2835_v2  ;;  %v2919_v2 = vld [vmem:[#allocation3 + $0x2b0] ss:$8 sps:$4 sm:$0xff]  }
  0xac   :  { %2150 = vmatpush1.bf16.msra.mxu0 %v2838_v3  ;;  %1946 = vmatprep.subr.bf16.mxu1 %v2843_v4  ;;  %v2922_v3 = vld [vmem:[#allocation3 + $0x7b0] ss:$8 sps:$4 sm:$0xff]   ;;  %v2927_v4 = vld [vmem:[#allocation3 + $0x2c4] ss:$8 sps:$4 sm:$0xff]  }
  0xad   :  { %2151 = vmatprep.subr.bf16.mxu0 %v2846_v5  ;;  %v2930_v5 = vld [vmem:[#allocation3 + $0x7c4] ss:$8 sps:$4 sm:$0xff]  }
  0xaf   :  { %1947 = vmatpush1.bf16.msra.mxu1 %v2841_v6  ;;  %v2925_v6 = vld [vmem:[#allocation3 + $0x2c0] ss:$8 sps:$4 sm:$0xff]  }
  0xb0   :  { %2152 = vmatpush1.bf16.msra.mxu0 %v2844_v7  ;;  %1948 = vmatprep.subr.bf16.mxu1 %v2849_v8  ;;  %v2928_v7 = vld [vmem:[#allocation3 + $0x7c0] ss:$8 sps:$4 sm:$0xff]   ;;  %v2933_v8 = vld [vmem:[#allocation3 + $0x2d4] ss:$8 sps:$4 sm:$0xff]  }
  0xb1   :  { %2153 = vmatprep.subr.bf16.mxu0 %v2852_v9  ;;  %v2936_v9 = vld [vmem:[#allocation3 + $0x7d4] ss:$8 sps:$4 sm:$0xff]  }
  0xb3   :  { %1949 = vmatpush1.bf16.msra.mxu1 %v2847_v10  ;;  %v2931_v10 = vld [vmem:[#allocation3 + $0x2d0] ss:$8 sps:$4 sm:$0xff]  }
  0xb4   :  { %2154 = vmatpush1.bf16.msra.mxu0 %v2850_v11  ;;  %1959 = vmatprep.subr.bf16.mxu1 %v2855_v12  ;;  %v2934_v11 = vld [vmem:[#allocation3 + $0x7d0] ss:$8 sps:$4 sm:$0xff]   ;;  %v2939_v12 = vld [vmem:[#allocation3 + $0x2e4] ss:$8 sps:$4 sm:$0xff]  }
  0xb5   :  { %2164 = vmatprep.subr.bf16.mxu0 %v2858_v15  ;;  %v2940_v15 = vld [vmem:[#allocation3 + $0x7e0] ss:$8 sps:$4 sm:$0xff]  }
  0xb6   :  { %1951 = vmatmul.mubr.bf16.vlgmr.msra.gmra.mrb[0].mxu1 %v80_v18  ;;  %v2943_v18 = vld [vmem:[#allocation3 + $0x2f0] ss:$8 sps:$4 sm:$0xff]  }
  0xb7   :  { %2156 = vmatmul.mubr.bf16.vlgmr.msra.gmra.mrb[0].mxu0 %v90_v19  ;;  %1960 = vmatpush1.bf16.msra.mxu1 %v2853_v16  ;;  %v2945_v16 = vld [vmem:[#allocation3 + $0x2f4] ss:$8 sps:$4 sm:$0xff]   ;;  %v2946_v19 = vld [vmem:[#allocation3 + $0x7f0] ss:$8 sps:$4 sm:$0xff]  }
  0xb8   :  { %2165 = vmatpush1.bf16.msra.mxu0 %v2856_v17  ;;  %1961 = vmatprep.subr.bf16.mxu1 %v2861_v20  ;;  %v2948_v17 = vld [vmem:[#allocation3 + $0x7f4] ss:$8 sps:$4 sm:$0xff]   ;;  %v63_v20 = vld [vmem:[%s3318_s0 + $0x20] sm:$0xff] }
  0xb9   :  { %2166 = vmatprep.subr.bf16.mxu0 %v2864_v21  ;;  %1991 = vmatprep.mubr.bf16.mxu1 %v83_v24  ;;  %v73_v21 = vld [vmem:[%s3318_s0 + $0x70] sm:$0xff]  ;;  %v2949_v24 = vld [vmem:[#allocation3 + $0x300] ss:$8 sps:$4 sm:$0xff]   ;;  %v82_v26 = vpack.c.bf16 %v63_v20, %v63_v20  ;;  %v3035_v20 = vld [vmem:[#allocation3 + $0x3e4] ss:$8 sps:$4 sm:$0xff]  }
  0xba   :  { %2196 = vmatprep.mubr.bf16.mxu0 %v93_v29  ;;  %v2952_v29 = vld [vmem:[#allocation3 + $0x800] ss:$8 sps:$4 sm:$0xff]  }
  0xbb   :  { %1962 = vmatpush1.bf16.msra.mxu1 %v2859_v23  ;;  %v2954_v23 = vld [vmem:[#allocation3 + $0x804] ss:$8 sps:$4 sm:$0xff]  }
  0xbc   :  { %2167 = vmatpush1.bf16.msra.mxu0 %v2862_v25  ;;  %1963 = vmatprep.subr.bf16.mxu1 %v2867_v27  ;;  %v76_v25 = vld [vmem:[%s3318_s0 + $0x88] sm:$0xff]  ;;  %v92_v27 = vpack.c.bf16 %v73_v21, %v73_v21 }
  0xbd   :  { %2168 = vmatprep.subr.bf16.mxu0 %v2870_v28  ;;  %v66_v28 = vld [vmem:[%s3318_s0 + $0x38] sm:$0xff]  ;;  %v3038_v21 = vld [vmem:[#allocation3 + $0x8e4] ss:$8 sps:$4 sm:$0xff]  }
  0xbf   :  { %1964 = vmatpush1.bf16.msra.mxu1 %v2865_v30  ;;  %v2957_v30 = vld [vmem:[#allocation3 + $0x314] ss:$8 sps:$4 sm:$0xff]  }
  0xc0   :  { %2169 = vmatpush1.bf16.msra.mxu0 %v2868_v31  ;;  %1965 = vmatprep.subr.bf16.mxu1 %v2873_v32  ;;  %v2960_v31 = vld [vmem:[#allocation3 + $0x814] ss:$8 sps:$4 sm:$0xff]   ;;  %v95_v32 = vpack.c.bf16 %v76_v25, %v76_v25 }
  0xc1   :  { %2170 = vmatprep.subr.bf16.mxu0 %v2876_v33  ;;  %v85_v33 = vpack.c.bf16 %v66_v28, %v66_v28  ;;  %v3044_v25 = vld [vmem:[#allocation3 + $0x8f4] ss:$8 sps:$4 sm:$0xff]   ;;  %v75_v28 = vld [vmem:[%s3318_s0 + $0x80] sm:$0xff] }
  0xc3   :  { %1966 = vmatpush1.bf16.msra.mxu1 %v2871_v34  ;;  %v2955_v34 = vld [vmem:[#allocation3 + $0x310] ss:$8 sps:$4 sm:$0xff]  }
  0xc4   :  { %2171 = vmatpush1.bf16.msra.mxu0 %v2874_v35  ;;  %1967 = vmatprep.subr.bf16.mxu1 %v2879_v36  ;;  %v2958_v35 = vld [vmem:[#allocation3 + $0x810] ss:$8 sps:$4 sm:$0xff]   ;;  %v2963_v36 = vld [vmem:[#allocation3 + $0x324] ss:$8 sps:$4 sm:$0xff]  }
  0xc5   :  { %2172 = vmatprep.subr.bf16.mxu0 %v2882_v37  ;;  %v2966_v37 = vld [vmem:[#allocation3 + $0x824] ss:$8 sps:$4 sm:$0xff]  }
  0xc7   :  { %1968 = vmatpush1.bf16.msra.mxu1 %v2877_v38  ;;  %v2961_v38 = vld [vmem:[#allocation3 + $0x320] ss:$8 sps:$4 sm:$0xff]  }
  0xc8   :  { %2173 = vmatpush1.bf16.msra.mxu0 %v2880_v39  ;;  %1969 = vmatprep.subr.bf16.mxu1 %v2885_v40  ;;  %v2964_v39 = vld [vmem:[#allocation3 + $0x820] ss:$8 sps:$4 sm:$0xff]   ;;  %v2969_v40 = vld [vmem:[#allocation3 + $0x334] ss:$8 sps:$4 sm:$0xff]  }
  0xc9   :  { %2174 = vmatprep.subr.bf16.mxu0 %v2888_v41  ;;  %v2972_v41 = vld [vmem:[#allocation3 + $0x834] ss:$8 sps:$4 sm:$0xff]  }
  0xcb   :  { %1970 = vmatpush1.bf16.msra.mxu1 %v2883_v42  ;;  %v2967_v42 = vld [vmem:[#allocation3 + $0x330] ss:$8 sps:$4 sm:$0xff]  }
  0xcc   :  { %2175 = vmatpush1.bf16.msra.mxu0 %v2886_v43  ;;  %1971 = vmatprep.subr.bf16.mxu1 %v2891_v44  ;;  %v2970_v43 = vld [vmem:[#allocation3 + $0x830] ss:$8 sps:$4 sm:$0xff]   ;;  %v2975_v44 = vld [vmem:[#allocation3 + $0x344] ss:$8 sps:$4 sm:$0xff]  }
  0xcd   :  { %2176 = vmatprep.subr.bf16.mxu0 %v2894_v45  ;;  %v2978_v45 = vld [vmem:[#allocation3 + $0x844] ss:$8 sps:$4 sm:$0xff]  }
  0xcf   :  { %1972 = vmatpush1.bf16.msra.mxu1 %v2889_v46  ;;  %v2973_v46 = vld [vmem:[#allocation3 + $0x340] ss:$8 sps:$4 sm:$0xff]  }
  0xd0   :  { %2177 = vmatpush1.bf16.msra.mxu0 %v2892_v47  ;;  %1973 = vmatprep.subr.bf16.mxu1 %v2897_v48  ;;  %v2976_v47 = vld [vmem:[#allocation3 + $0x840] ss:$8 sps:$4 sm:$0xff]   ;;  %v2981_v48 = vld [vmem:[#allocation3 + $0x354] ss:$8 sps:$4 sm:$0xff]  }
  0xd1   :  { %2178 = vmatprep.subr.bf16.mxu0 %v2900_v49  ;;  %v2984_v49 = vld [vmem:[#allocation3 + $0x854] ss:$8 sps:$4 sm:$0xff]  }
  0xd3   :  { %1974 = vmatpush1.bf16.msra.mxu1 %v2895_v50  ;;  %v2979_v50 = vld [vmem:[#allocation3 + $0x350] ss:$8 sps:$4 sm:$0xff]  }
  0xd4   :  { %2179 = vmatpush1.bf16.msra.mxu0 %v2898_v51  ;;  %1975 = vmatprep.subr.bf16.mxu1 %v2903_v52  ;;  %v2982_v51 = vld [vmem:[#allocation3 + $0x850] ss:$8 sps:$4 sm:$0xff]   ;;  %v2987_v52 = vld [vmem:[#allocation3 + $0x364] ss:$8 sps:$4 sm:$0xff]  }
  0xd5   :  { %2180 = vmatprep.subr.bf16.mxu0 %v2906_v53  ;;  %v2990_v53 = vld [vmem:[#allocation3 + $0x864] ss:$8 sps:$4 sm:$0xff]  }
  0xd7   :  { %1976 = vmatpush1.bf16.msra.mxu1 %v2901_v54  ;;  %v2985_v54 = vld [vmem:[#allocation3 + $0x360] ss:$8 sps:$4 sm:$0xff]  }
  0xd8   :  { %2181 = vmatpush1.bf16.msra.mxu0 %v2904_v55  ;;  %1977 = vmatprep.subr.bf16.mxu1 %v2909_v56  ;;  %v2988_v55 = vld [vmem:[#allocation3 + $0x860] ss:$8 sps:$4 sm:$0xff]   ;;  %v2993_v56 = vld [vmem:[#allocation3 + $0x374] ss:$8 sps:$4 sm:$0xff]  }
  0xd9   :  { %2182 = vmatprep.subr.bf16.mxu0 %v2912_v57  ;;  %v2996_v57 = vld [vmem:[#allocation3 + $0x874] ss:$8 sps:$4 sm:$0xff]  }
  0xdb   :  { %1978 = vmatpush1.bf16.msra.mxu1 %v2907_v58  ;;  %v2991_v58 = vld [vmem:[#allocation3 + $0x370] ss:$8 sps:$4 sm:$0xff]  }
  0xdc   :  { %2183 = vmatpush1.bf16.msra.mxu0 %v2910_v59  ;;  %1979 = vmatprep.subr.bf16.mxu1 %v2915_v60  ;;  %v2994_v59 = vld [vmem:[#allocation3 + $0x870] ss:$8 sps:$4 sm:$0xff]   ;;  %v2999_v60 = vld [vmem:[#allocation3 + $0x384] ss:$8 sps:$4 sm:$0xff]  }
  0xdd   :  { %2184 = vmatprep.subr.bf16.mxu0 %v2918_v61  ;;  %v3002_v61 = vld [vmem:[#allocation3 + $0x884] ss:$8 sps:$4 sm:$0xff]  }
  0xdf   :  { %1980 = vmatpush1.bf16.msra.mxu1 %v2913_v62  ;;  %v2997_v62 = vld [vmem:[#allocation3 + $0x380] ss:$8 sps:$4 sm:$0xff]  }
  0xe0   :  { %2185 = vmatpush1.bf16.msra.mxu0 %v2916_v63  ;;  %1981 = vmatprep.subr.bf16.mxu1 %v2921_v0  ;;  %v3000_v63 = vld [vmem:[#allocation3 + $0x880] ss:$8 sps:$4 sm:$0xff]   ;;  %v3005_v0 = vld [vmem:[#allocation3 + $0x394] ss:$8 sps:$4 sm:$0xff]  }
  0xe1   :  { %2186 = vmatprep.subr.bf16.mxu0 %v2924_v1  ;;  %v3008_v1 = vld [vmem:[#allocation3 + $0x894] ss:$8 sps:$4 sm:$0xff]  }
  0xe3   :  { %1982 = vmatpush1.bf16.msra.mxu1 %v2919_v2  ;;  %v3003_v2 = vld [vmem:[#allocation3 + $0x390] ss:$8 sps:$4 sm:$0xff]  }
  0xe4   :  { %2187 = vmatpush1.bf16.msra.mxu0 %v2922_v3  ;;  %1983 = vmatprep.subr.bf16.mxu1 %v2927_v4  ;;  %v3006_v3 = vld [vmem:[#allocation3 + $0x890] ss:$8 sps:$4 sm:$0xff]   ;;  %v3011_v4 = vld [vmem:[#allocation3 + $0x3a4] ss:$8 sps:$4 sm:$0xff]  }
  0xe5   :  { %2188 = vmatprep.subr.bf16.mxu0 %v2930_v5  ;;  %v3014_v5 = vld [vmem:[#allocation3 + $0x8a4] ss:$8 sps:$4 sm:$0xff]  }
  0xe7   :  { %1984 = vmatpush1.bf16.msra.mxu1 %v2925_v6  ;;  %v3009_v6 = vld [vmem:[#allocation3 + $0x3a0] ss:$8 sps:$4 sm:$0xff]  }
  0xe8   :  { %2189 = vmatpush1.bf16.msra.mxu0 %v2928_v7  ;;  %1985 = vmatprep.subr.bf16.mxu1 %v2933_v8  ;;  %v3012_v7 = vld [vmem:[#allocation3 + $0x8a0] ss:$8 sps:$4 sm:$0xff]   ;;  %v3017_v8 = vld [vmem:[#allocation3 + $0x3b4] ss:$8 sps:$4 sm:$0xff]  }
  0xe9   :  { %2190 = vmatprep.subr.bf16.mxu0 %v2936_v9  ;;  %v3020_v9 = vld [vmem:[#allocation3 + $0x8b4] ss:$8 sps:$4 sm:$0xff]  }
  0xeb   :  { %1986 = vmatpush1.bf16.msra.mxu1 %v2931_v10  ;;  %v3015_v10 = vld [vmem:[#allocation3 + $0x3b0] ss:$8 sps:$4 sm:$0xff]  }
  0xec   :  { %2191 = vmatpush1.bf16.msra.mxu0 %v2934_v11  ;;  %1987 = vmatprep.subr.bf16.mxu1 %v2939_v12  ;;  %v3018_v11 = vld [vmem:[#allocation3 + $0x8b0] ss:$8 sps:$4 sm:$0xff]   ;;  %v3023_v12 = vld [vmem:[#allocation3 + $0x3c4] ss:$8 sps:$4 sm:$0xff]  }
  0xed   :  { %2192 = vmatprep.subr.bf16.mxu0 %v2942_v13  ;;  %v3026_v13 = vld [vmem:[#allocation3 + $0x8c4] ss:$8 sps:$4 sm:$0xff]  }
  0xef   :  { %1988 = vmatpush1.bf16.msra.mxu1 %v2937_v14  ;;  %v3021_v14 = vld [vmem:[#allocation3 + $0x3c0] ss:$8 sps:$4 sm:$0xff]  }
  0xf0   :  { %2193 = vmatpush1.bf16.msra.mxu0 %v2940_v15  ;;  %1989 = vmatprep.subr.bf16.mxu1 %v2945_v16  ;;  %v3024_v15 = vld [vmem:[#allocation3 + $0x8c0] ss:$8 sps:$4 sm:$0xff]   ;;  %v3029_v16 = vld [vmem:[#allocation3 + $0x3d4] ss:$8 sps:$4 sm:$0xff]  }
  0xf1   :  { %2194 = vmatprep.subr.bf16.mxu0 %v2948_v17  ;;  %v3032_v17 = vld [vmem:[#allocation3 + $0x8d4] ss:$8 sps:$4 sm:$0xff]  }
  0xf3   :  { %1990 = vmatpush1.bf16.msra.mxu1 %v2943_v18  ;;  %v3027_v18 = vld [vmem:[#allocation3 + $0x3d0] ss:$8 sps:$4 sm:$0xff]  }
  0xf4   :  { %2195 = vmatpush1.bf16.msra.mxu0 %v2946_v19  ;;  %2000 = vmatprep.subr.bf16.mxu1 %v2951_v22  ;;  %v3030_v19 = vld [vmem:[#allocation3 + $0x8d0] ss:$8 sps:$4 sm:$0xff]   ;;  %v3033_v22 = vld [vmem:[#allocation3 + $0x3e0] ss:$8 sps:$4 sm:$0xff]  }
  0xf5   :  { %2205 = vmatprep.subr.bf16.mxu0 %v2954_v23  ;;  %v3036_v23 = vld [vmem:[#allocation3 + $0x8e0] ss:$8 sps:$4 sm:$0xff]  }
  0xf6   :  { %1992 = vmatmul.mubr.bf16.vlgmr.msra.gmra.mrb[0].mxu1 %v82_v26  ;;  %v3039_v26 = vld [vmem:[#allocation3 + $0x3f0] ss:$8 sps:$4 sm:$0xff]  }
  0xf7   :  { %2197 = vmatmul.mubr.bf16.vlgmr.msra.gmra.mrb[0].mxu0 %v92_v27  ;;  %2001 = vmatpush1.bf16.msra.mxu1 %v2949_v24  ;;  %v3041_v24 = vld [vmem:[#allocation3 + $0x3f4] ss:$8 sps:$4 sm:$0xff]   ;;  %v3042_v27 = vld [vmem:[#allocation3 + $0x8f0] ss:$8 sps:$4 sm:$0xff]  }
  0xf8   :  { %2206 = vmatpush1.bf16.msra.mxu0 %v2952_v29  ;;  %2002 = vmatprep.subr.bf16.mxu1 %v2957_v30  ;;  %v65_v29 = vld [vmem:[%s3318_s0 + $0x30] sm:$0xff]  ;;  %v3047_v30 = vld [vmem:[#allocation3 + $0x404] ss:$8 sps:$4 sm:$0xff]  }
  0xf9   :  { %2207 = vmatprep.subr.bf16.mxu0 %v2960_v31  ;;  %2237 = vmatprep.mubr.bf16.mxu0 %v95_v32  ;;  %v3050_v31 = vld [vmem:[#allocation3 + $0x904] ss:$8 sps:$4 sm:$0xff]   ;;  %v94_v32 = vpack.c.bf16 %v75_v28, %v75_v28 }
  0xfa   :  { %2032 = vmatprep.mubr.bf16.mxu1 %v85_v33  ;;  %v84_v33 = vpack.c.bf16 %v65_v29, %v65_v29 }
  0xfb   :  { %2003 = vmatpush1.bf16.msra.mxu1 %v2955_v34  ;;  %v68_v34 = vld [vmem:[%s3318_s0 + $0x48] sm:$0xff] }
  0xfc   :  { %2208 = vmatpush1.bf16.msra.mxu0 %v2958_v35  ;;  %2004 = vmatprep.subr.bf16.mxu1 %v2963_v36  ;;  %v3045_v35 = vld [vmem:[#allocation3 + $0x400] ss:$8 sps:$4 sm:$0xff]  }
  0xfd   :  { %2209 = vmatprep.subr.bf16.mxu0 %v2966_v37  ;;  %v3048_v36 = vld [vmem:[#allocation3 + $0x900] ss:$8 sps:$4 sm:$0xff]   ;;  %v3053_v37 = vld [vmem:[#allocation3 + $0x414] ss:$8 sps:$4 sm:$0xff]  }
  0xff   :  { %2005 = vmatpush1.bf16.msra.mxu1 %v2961_v38  ;;  %v3056_v38 = vld [vmem:[#allocation3 + $0x914] ss:$8 sps:$4 sm:$0xff]  }
 0x100   :  { %2210 = vmatpush1.bf16.msra.mxu0 %v2964_v39  ;;  %2006 = vmatprep.subr.bf16.mxu1 %v2969_v40  ;;  %v87_v39 = vpack.c.bf16 %v68_v34, %v68_v34  ;;  %v3051_v40 = vld [vmem:[#allocation3 + $0x410] ss:$8 sps:$4 sm:$0xff]  }
 0x101   :  { %2211 = vmatprep.subr.bf16.mxu0 %v2972_v41  ;;  %v3054_v41 = vld [vmem:[#allocation3 + $0x910] ss:$8 sps:$4 sm:$0xff]  }
 0x103   :  { %2007 = vmatpush1.bf16.msra.mxu1 %v2967_v42  ;;  %v3059_v42 = vld [vmem:[#allocation3 + $0x424] ss:$8 sps:$4 sm:$0xff]  }
 0x104   :  { %2212 = vmatpush1.bf16.msra.mxu0 %v2970_v43  ;;  %2008 = vmatprep.subr.bf16.mxu1 %v2975_v44  ;;  %v3062_v43 = vld [vmem:[#allocation3 + $0x924] ss:$8 sps:$4 sm:$0xff]   ;;  %v3181_v44 = vmov 0  }
 0x105   :  { %2213 = vmatprep.subr.bf16.mxu0 %v2978_v45  ;;  %v3057_v45 = vld [vmem:[#allocation3 + $0x420] ss:$8 sps:$4 sm:$0xff]  }
 0x107   :  { %2009 = vmatpush1.bf16.msra.mxu1 %v2973_v46  ;;  %v3060_v46 = vld [vmem:[#allocation3 + $0x920] ss:$8 sps:$4 sm:$0xff]  }
 0x108   :  { %2214 = vmatpush1.bf16.msra.mxu0 %v2976_v47  ;;  %2010 = vmatprep.subr.bf16.mxu1 %v2981_v48  ;;  %v77_v47 = vld [vmem:[%s3318_s0 + $0x90] sm:$0xff] }
 0x109   :  { %2215 = vmatprep.subr.bf16.mxu0 %v2984_v49  ;;  %v3065_v48 = vld [vmem:[#allocation3 + $0x434] ss:$8 sps:$4 sm:$0xff]   ;;  %v96_v49 = vpack.c.bf16 %v77_v47, %v77_v47 }
 0x10b   :  { %2011 = vmatpush1.bf16.msra.mxu1 %v2979_v50  ;;  %v3063_v50 = vld [vmem:[#allocation3 + $0x430] ss:$8 sps:$4 sm:$0xff]  }
 0x10c   :  { %2216 = vmatpush1.bf16.msra.mxu0 %v2982_v51  ;;  %2012 = vmatprep.subr.bf16.mxu1 %v2987_v52  ;;  %v3068_v51 = vld [vmem:[#allocation3 + $0x444] ss:$8 sps:$4 sm:$0xff]   ;;  %v3066_v52 = vld [vmem:[#allocation3 + $0x440] ss:$8 sps:$4 sm:$0xff]  }
 0x10d   :  { %2217 = vmatprep.subr.bf16.mxu0 %v2990_v53  ;;  %v3071_v53 = vld [vmem:[#allocation3 + $0x454] ss:$8 sps:$4 sm:$0xff]  }
 0x10f   :  { %2013 = vmatpush1.bf16.msra.mxu1 %v2985_v54  ;;  %v3069_v54 = vld [vmem:[#allocation3 + $0x450] ss:$8 sps:$4 sm:$0xff]  }
 0x110   :  { %2218 = vmatpush1.bf16.msra.mxu0 %v2988_v55  ;;  %2014 = vmatprep.subr.bf16.mxu1 %v2993_v56  ;;  %v3074_v55 = vld [vmem:[#allocation3 + $0x464] ss:$8 sps:$4 sm:$0xff]   ;;  %v3072_v56 = vld [vmem:[#allocation3 + $0x460] ss:$8 sps:$4 sm:$0xff]  }
 0x111   :  { %2219 = vmatprep.subr.bf16.mxu0 %v2996_v57  ;;  %v3077_v57 = vld [vmem:[#allocation3 + $0x474] ss:$8 sps:$4 sm:$0xff]  }
 0x113   :  { %2015 = vmatpush1.bf16.msra.mxu1 %v2991_v58  ;;  %v3075_v58 = vld [vmem:[#allocation3 + $0x470] ss:$8 sps:$4 sm:$0xff]  }
 0x114   :  { %2220 = vmatpush1.bf16.msra.mxu0 %v2994_v59  ;;  %2016 = vmatprep.subr.bf16.mxu1 %v2999_v60  ;;  %v3080_v59 = vld [vmem:[#allocation3 + $0x484] ss:$8 sps:$4 sm:$0xff]   ;;  %v3078_v60 = vld [vmem:[#allocation3 + $0x480] ss:$8 sps:$4 sm:$0xff]  }
 0x115   :  { %2221 = vmatprep.subr.bf16.mxu0 %v3002_v61  ;;  %v3083_v61 = vld [vmem:[#allocation3 + $0x494] ss:$8 sps:$4 sm:$0xff]  }
 0x117   :  { %2017 = vmatpush1.bf16.msra.mxu1 %v2997_v62  ;;  %v3081_v62 = vld [vmem:[#allocation3 + $0x490] ss:$8 sps:$4 sm:$0xff]  }
 0x118   :  { %2222 = vmatpush1.bf16.msra.mxu0 %v3000_v63  ;;  %2018 = vmatprep.subr.bf16.mxu1 %v3005_v0  ;;  %v3086_v63 = vld [vmem:[#allocation3 + $0x4a4] ss:$8 sps:$4 sm:$0xff]   ;;  %v3084_v0 = vld [vmem:[#allocation3 + $0x4a0] ss:$8 sps:$4 sm:$0xff]  }
 0x119   :  { %2223 = vmatprep.subr.bf16.mxu0 %v3008_v1  ;;  %v3089_v1 = vld [vmem:[#allocation3 + $0x4b4] ss:$8 sps:$4 sm:$0xff]  }
 0x11b   :  { %2019 = vmatpush1.bf16.msra.mxu1 %v3003_v2  ;;  %v3087_v2 = vld [vmem:[#allocation3 + $0x4b0] ss:$8 sps:$4 sm:$0xff]  }
 0x11c   :  { %2224 = vmatpush1.bf16.msra.mxu0 %v3006_v3  ;;  %2020 = vmatprep.subr.bf16.mxu1 %v3011_v4  ;;  %v3092_v3 = vld [vmem:[#allocation3 + $0x4c4] ss:$8 sps:$4 sm:$0xff]   ;;  %v3090_v4 = vld [vmem:[#allocation3 + $0x4c0] ss:$8 sps:$4 sm:$0xff]  }
 0x11d   :  { %2225 = vmatprep.subr.bf16.mxu0 %v3014_v5  ;;  %v3095_v5 = vld [vmem:[#allocation3 + $0x4d4] ss:$8 sps:$4 sm:$0xff]  }
 0x11f   :  { %2021 = vmatpush1.bf16.msra.mxu1 %v3009_v6  ;;  %v3093_v6 = vld [vmem:[#allocation3 + $0x4d0] ss:$8 sps:$4 sm:$0xff]  }
 0x120   :  { %2226 = vmatpush1.bf16.msra.mxu0 %v3012_v7  ;;  %2022 = vmatprep.subr.bf16.mxu1 %v3017_v8  ;;  %v3098_v7 = vld [vmem:[#allocation3 + $0x4e4] ss:$8 sps:$4 sm:$0xff]   ;;  %v3096_v8 = vld [vmem:[#allocation3 + $0x4e0] ss:$8 sps:$4 sm:$0xff]  }
 0x121   :  { %2227 = vmatprep.subr.bf16.mxu0 %v3020_v9  ;;  %v3101_v9 = vld [vmem:[#allocation3 + $0x4f4] ss:$8 sps:$4 sm:$0xff]  }
 0x123   :  { %2023 = vmatpush1.bf16.msra.mxu1 %v3015_v10  ;;  %v3099_v10 = vld [vmem:[#allocation3 + $0x4f0] ss:$8 sps:$4 sm:$0xff]  }
 0x124   :  { %2228 = vmatpush1.bf16.msra.mxu0 %v3018_v11  ;;  %2024 = vmatprep.subr.bf16.mxu1 %v3023_v12  ;;  %v67_v11 = vld [vmem:[%s3318_s0 + $0x40] sm:$0xff] }
 0x125   :  { %2229 = vmatprep.subr.bf16.mxu0 %v3026_v13  ;;  %v86_v12 = vpack.c.bf16 %v67_v11, %v67_v11 }
 0x127   :  { %2025 = vmatpush1.bf16.msra.mxu1 %v3021_v14 }
 0x128   :  { %2230 = vmatpush1.bf16.msra.mxu0 %v3024_v15  ;;  %2026 = vmatprep.subr.bf16.mxu1 %v3029_v16 }
 0x129   :  { %2231 = vmatprep.subr.bf16.mxu0 %v3032_v17  ;;  %v393_v17 = vlaneseq }
 0x12b   :  { %2027 = vmatpush1.bf16.msra.mxu1 %v3027_v18  ;;  %v394_v18 = vshrl.u32 %v393_v17, 7 }
 0x12c   :  { %2232 = vmatpush1.bf16.msra.mxu0 %v3030_v19  ;;  %2028 = vmatprep.subr.bf16.mxu1 %v3035_v20  ;;  %v391_v20 = vld [vmem:[#allocation5] sm:$0x3] }
 0x12d   :  { %2233 = vmatprep.subr.bf16.mxu0 %v3038_v21  ;;  %v395_v19 = vsub.s32 0, %v394_v18  ;;  %v399_v21 = vsub.s32 1, %v394_v18 }
 0x12f   :  { %2029 = vmatpush1.bf16.msra.mxu1 %v3033_v22  ;;  %v396_v22 = vrot.slane %v391_v20, %v395_v19 }
 0x130   :  { %2234 = vmatpush1.bf16.msra.mxu0 %v3036_v23  ;;  %2030 = vmatprep.subr.bf16.mxu1 %v3041_v24  ;;  %v400_v23 = vrot.slane %v391_v20, %v399_v21 }
 0x131   :  { %2235 = vmatprep.subr.bf16.mxu0 %v3044_v25  ;;  %v2289_v25 = vld [vmem:[#allocation7] sm:$0x3] }
 0x132   :  { %v2298_v34 = vrot.slane %v2289_v25, %v399_v21 }
 0x133   :  { %2031 = vmatpush1.bf16.msra.mxu1 %v3039_v26 }
 0x134   :  { %2236 = vmatpush1.bf16.msra.mxu0 %v3042_v27  ;;  %2041 = vmatprep.subr.bf16.mxu1 %v3047_v30 }
 0x135   :  { %2246 = vmatprep.subr.bf16.mxu0 %v3050_v31 }
 0x136   :  { %2033 = vmatmul.mubr.bf16.vlgmr.msra.gmra.mrb[0].mxu1 %v84_v33 }
 0x137   :  { %2238 = vmatmul.mubr.bf16.vlgmr.msra.gmra.mrb[0].mxu0 %v94_v32  ;;  %2042 = vmatpush1.bf16.msra.mxu1 %v3045_v35  ;;  %v2294_v32 = vrot.slane %v2289_v25, %v395_v19 }
 0x138   :  { %2247 = vmatpush1.bf16.msra.mxu0 %v3048_v36  ;;  %2043 = vmatprep.subr.bf16.mxu1 %v3053_v37 }
 0x139   :  { %2248 = vmatprep.subr.bf16.mxu0 %v3056_v38  ;;  %2278 = vmatprep.mubr.bf16.mxu0 %v3181_v44 }
 0x13a   :  { %2073 = vmatprep.mubr.bf16.mxu1 %v87_v39 }
 0x13b   :  { %2044 = vmatpush1.bf16.msra.mxu1 %v3051_v40  ;;  %v2307_v40 = vstv %s3322_s4 }
 0x13c   :  { %2249 = vmatpush1.bf16.msra.mxu0 %v3054_v41  ;;  %2045 = vmatprep.subr.bf16.mxu1 %v3059_v42 }
 0x13d   :  { %2250 = vmatprep.subr.bf16.mxu0 %v3062_v43 }
 0x13f   :  { %2046 = vmatpush1.bf16.msra.mxu1 %v3057_v45 }
 0x140   :  { %2251 = vmatpush1.bf16.msra.mxu0 %v3060_v46  ;;  %2047 = vmatprep.subr.bf16.mxu1 %v3065_v48 }
 0x143   :  { %2617 = vmatmul.mubr.msk.bf16.vlgmr.msra.gmra.mrb[0].mxu0 %vm1873_vm0, %v96_v49  ;;  %2048 = vmatpush1.bf16.msra.mxu1 %v3063_v50 }
 0x144   :  { %2049 = vmatprep.subr.bf16.mxu1 %v3068_v51 }
 0x147   :  { %2050 = vmatpush1.bf16.msra.mxu1 %v3066_v52 }
 0x148   :  { %2051 = vmatprep.subr.bf16.mxu1 %v3071_v53 }
 0x14b   :  { %2052 = vmatpush1.bf16.msra.mxu1 %v3069_v54 }
 0x14c   :  { %2053 = vmatprep.subr.bf16.mxu1 %v3074_v55 }
 0x14f   :  { %2054 = vmatpush1.bf16.msra.mxu1 %v3072_v56 }
 0x150   :  { %2055 = vmatprep.subr.bf16.mxu1 %v3077_v57 }
 0x153   :  { %2056 = vmatpush1.bf16.msra.mxu1 %v3075_v58 }
 0x154   :  { %2057 = vmatprep.subr.bf16.mxu1 %v3080_v59 }
 0x157   :  { %2058 = vmatpush1.bf16.msra.mxu1 %v3078_v60 }
 0x158   :  { %2059 = vmatprep.subr.bf16.mxu1 %v3083_v61 }
 0x15b   :  { %2060 = vmatpush1.bf16.msra.mxu1 %v3081_v62 }
 0x15c   :  { %2061 = vmatprep.subr.bf16.mxu1 %v3086_v63 }
 0x15f   :  { %2062 = vmatpush1.bf16.msra.mxu1 %v3084_v0 }
 0x160   :  { %2063 = vmatprep.subr.bf16.mxu1 %v3089_v1 }
 0x163   :  { %2064 = vmatpush1.bf16.msra.mxu1 %v3087_v2 }
 0x164   :  { %2065 = vmatprep.subr.bf16.mxu1 %v3092_v3 }
 0x167   :  { %2066 = vmatpush1.bf16.msra.mxu1 %v3090_v4 }
 0x168   :  { %2067 = vmatprep.subr.bf16.mxu1 %v3095_v5 }
 0x16b   :  { %2068 = vmatpush1.bf16.msra.mxu1 %v3093_v6 }
 0x16c   :  { %2069 = vmatprep.subr.bf16.mxu1 %v3098_v7 }
 0x16f   :  { %2070 = vmatpush1.bf16.msra.mxu1 %v3096_v8 }
 0x170   :  { %2071 = vmatprep.subr.bf16.mxu1 %v3101_v9 }
 0x173   :  { %2072 = vmatpush1.bf16.msra.mxu1 %v3099_v10 }
 0x176   :  { %2074 = vmatmul.mubr.bf16.vlgmr.msra.gmra.mrb[0].mxu1 %v86_v12 }
 0x216   :  { %v2280_v13 = vpop.f32.mrb[0].mxu0 }
 0x217   :  { %v2282_v14 = vpop.f32.mrb[1].mxu0 }
 0x218   :  { %v2284_v15 = vpop.f32.mrb[2].mxu0 }
 0x219   :  { %v2285_v16 = vpop.f32.mrb[3].mxu0 }
 0x249   :  { %v2075_v24 = vpop.f32.mrb[0].mxu1 }
 0x24a   :  { %v2619_v26 = vadd.f32 %v2075_v24, %v396_v22  ;;  %v2077_v27 = vpop.f32.mrb[1].mxu1 }
 0x24b   :  { %v2621_v28 = vadd.f32 %v2077_v27, %v400_v23  ;;  %v2079_v29 = vpop.f32.mrb[2].mxu1 }
 0x24c   :  { %v2620_v30 = vadd.f32 %v2619_v26, %v2280_v13  ;;  %v2080_v31 = vpop.f32.mrb[3].mxu1 }
 0x24d   :  { %v2622_v33 = vadd.f32 %v2621_v28, %v2282_v14 }
 0x24e   :  { %v2287_v35 = vmax.f32 %v2620_v30, 0.0 }
 0x24f   :  { %v2288_v36 = vmax.f32 %v2622_v33, 0.0 }
 0x250   :  { %v2301_v37 = vmul.f32 %v2294_v32, %v2287_v35 }
 0x251   :  { %v2302_v38 = vmul.f32 %v2298_v34, %v2288_v36 }
 0x253   :  { %v2303_v39 = vadd.f32 %v2302_v38, %v2301_v37 }
 0x255   :  { %2304 = vadd.xlane.f32.xlu0 %v2303_v39 }
 0x2e2   :  { %v2305_v41 = vpop.xlane.xlu0 %2304 }
 0x2e3   :  { %v2308_v42 = vadd.f32 %v2307_v40, %v2305_v41 }
 0x2e5   :  { %v2618_v43 = vmul.f32 -1.442695, %v2308_v42 }
 0x2e7   :  { %3102 = vpow2.f32 %v2618_v43 }
 0x2f1   :  { %v3103_v44 = vpop.eup %3102 }
 0x2f2   :  { %v2312_v45 = vadd.f32 1.0, %v3103_v44 }
 0x2f4   :  { %3104 = vrcp.f32 %v2312_v45 }
 0x2fe   :  { %v3105_v46 = vpop.eup %3104 }
 0x2ff   :  { %2316 = vst.msk [vmem:[%s3323_s5] sm:$0xff] %vm2315_vm1, %v3105_v46 }
 0x300   :  { %2321 = vsyncpa [#allocation4], 1 }
 0x301   :  { %2322 = vsyncpa [#allocation6], 1 }

</bundles_post_ra>
